<compile_context>
chip_gen: v5e
topology: v5e:2x2
jax: 0.10.0
libtpu: 0.0.40
codegen_flags: <defaults>
</compile_context>

<pallas_src>
import functools

import jax
import jax.numpy as jnp
from jax import lax
from jax.experimental import pallas as pl
from jax.experimental.pallas import tpu as pltpu


# ----------------------------------------------------------------------------
# Kernel
# ----------------------------------------------------------------------------
def _pos_enc_kernel(seed_ref, x_ref, pe_ref, o_ref, *, batch, p, deterministic):
    """One sequence tile: out = dropout(x + pe) on a lane/sublane-dense view.

    x_ref / o_ref : (seq_tile, batch * d_model)   flattened (b, d) lanes
    pe_ref        : (seq_tile, d_model)           per-position table
    seed_ref      : (1,) int32 in SMEM (scalar prefetch)
    """
    x = x_ref[...]
    pe = pe_ref[...]
    if batch > 1:
        # Replicate pe across the batch along the lane axis inside VMEM so its
        # HBM traffic stays 1/batch of x (small-tile lane concat only).
        pe = jnp.concatenate([pe] * batch, axis=-1)
    y = x + pe                                    # pe already in x.dtype

    if (not deterministic) and p >= 1.0:
        y = jnp.zeros_like(y)
    elif (not deterministic) and p > 0.0:
        # Fused inverted dropout with a stateless hash PRNG: mix of
        # (seed, global element index).  Pure jnp integer ops (VPU work that
        # hides under the DMA of this memory-bound kernel).
        ts, ncols = y.shape
        rows = lax.broadcasted_iota(jnp.int32, (ts, ncols), 0)
        cols = lax.broadcasted_iota(jnp.int32, (ts, ncols), 1)
        row0 = pl.program_id(0) * ts
        gid = ((rows + row0).astype(jnp.uint32) * jnp.uint32(ncols)
               + cols.astype(jnp.uint32))
        h = gid * jnp.uint32(0x9E3779B1)
        h = h ^ (seed_ref[0].astype(jnp.uint32) * jnp.uint32(0x85EBCA77))
        h = h ^ (h >> 16)                         # murmur3 fmix32 finalizer
        h = h * jnp.uint32(0x85EBCA6B)
        h = h ^ (h >> 13)
        h = h * jnp.uint32(0xC2B2AE35)
        h = h ^ (h >> 16)
        threshold = jnp.uint32(min(int(round(p * 4294967296.0)), 4294967295))
        keep = h >= threshold                     # P(keep) = 1 - p
        scale = jnp.asarray(1.0 / (1.0 - p), dtype=y.dtype)
        y = jnp.where(keep, y * scale, jnp.zeros_like(y))

    o_ref[...] = y.astype(o_ref.dtype)


# ----------------------------------------------------------------------------
# Tiling / VMEM budgeting
# ----------------------------------------------------------------------------
@functools.lru_cache(maxsize=None)
def _vmem_limit_bytes():
    """Explicit scoped-VMEM limit: ~3/4 of physical, conservative fallback."""
    limit = 48 * 1024 * 1024                      # safe on v5e / v6e / v7x
    if jax.default_backend() == "tpu":
        try:
            phys = int(pltpu.get_tpu_info().vmem_capacity_bytes)
            limit = min(phys * 3 // 4, 100 * 1024 * 1024)
        except Exception:
            pass                                  # keep conservative fallback
    return limit


def _choose_seq_tile(S, B, D, itemsize, vmem_limit):
    """VMEM-budgeted sequence tile (multiple of the sublane granule, or == S)."""
    # Footprint ~= 2*(x blk) + 2*(out blk) + expanded-pe temp + 2*(pe blk)
    # ~= 7 block-equivalents worst case  ->  one block <= min(8 MiB, limit/8).
    per_block = min(8 * 1024 * 1024, vmem_limit // 8)
    lane_bytes = pl.cdiv(B * D, 128) * 128 * itemsize       # lane-padded row
    sub = max(8, 8 * (4 // max(1, itemsize)))                # 8 f32/16 bf16/32 i8
    max_rows = max(sub, per_block // lane_bytes)
    if max_rows >= S:
        if S >= 16 and S >= 2 * sub:
            # Split the parallel seq axis so both v7x TensorCores get work.
            return min(S, pl.cdiv(pl.cdiv(S, 2), sub) * sub)
        return S
    return min(S, max(sub, (max_rows // sub) * sub))


# ----------------------------------------------------------------------------
# Forward wrapper
# ----------------------------------------------------------------------------
def position_encoding_forward(x, pe, *, p=0.1, deterministic=True, seed=0):
    """x: [S, B, D]; pe: [max_len, D] (max_len >= S). Returns dropout(x + pe)."""
    S, B, D = x.shape
    itemsize = jnp.dtype(x.dtype).itemsize

    x2 = x.reshape(S, B * D)              # free, contiguous: lane-dense view
    pe_s = pe[:S].astype(x.dtype)         # pre-cast once (halves pe traffic, bf16)
    # TODO(synk): for bf16 x the add happens in bf16 (PyTorch promotes to f32).

    vmem_limit = _vmem_limit_bytes()
    seq_tile = _choose_seq_tile(S, B, D, itemsize, vmem_limit)
    grid = (pl.cdiv(S, seq_tile),)

    seed_arr = jnp.asarray(seed, dtype=jnp.int32).reshape((1,))
    kernel = functools.partial(_pos_enc_kernel, batch=B, p=float(p),
                               deterministic=bool(deterministic))

    out2 = pl.pallas_call(
        kernel,
        out_shape=jax.ShapeDtypeStruct((S, B * D), x.dtype),
        grid_spec=pltpu.PrefetchScalarGridSpec(
            num_scalar_prefetch=1,
            grid=grid,
            in_specs=[
                pl.BlockSpec((seq_tile, B * D), lambda i, seed_ref: (i, 0)),
                pl.BlockSpec((seq_tile, D), lambda i, seed_ref: (i, 0)),
            ],
            out_specs=pl.BlockSpec((seq_tile, B * D), lambda i, seed_ref: (i, 0)),
        ),
        input_output_aliases={1: 0},      # out reuses x (operand 1, after seed)
        compiler_params=pltpu.CompilerParams(
            dimension_semantics=("parallel",),
            vmem_limit_bytes=vmem_limit),
    )(seed_arr, x2, pe_s)

    return out2.reshape(S, B, D)


# ----------------------------------------------------------------------------
# Module port
# ----------------------------------------------------------------------------
class PositionEncoding:
    """JAX/Pallas port of the PyTorch PositionEncoding module (seq-major x)."""

    def __init__(self, d_model, max_len=5000, dropout=0.1):
        self.p = float(dropout)
        pos = jnp.arange(max_len, dtype=jnp.float32)[:, None]            # (L, 1)
        idx = jnp.arange(d_model)[None, :]                                # (1, D)
        expo = (2 * (idx // 2)).astype(jnp.float32) / float(d_model)
        angle = pos / jnp.power(jnp.float32(10000.0), expo)               # (L, D)
        self.pe = jnp.where(idx % 2 == 0, jnp.sin(angle), jnp.cos(angle))  # (L, D)

    def __call__(self, x, *, deterministic=True, seed=0):
        return position_encoding_forward(
            x, self.pe, p=self.p, deterministic=deterministic, seed=seed)


if __name__ == "__main__":
    d_model = 32
    S, B = 8, 2

    key = jax.random.PRNGKey(0)
    x = jax.random.normal(key, (S, B, d_model), dtype=jnp.float32)

    penc = PositionEncoding(d_model=d_model, max_len=64, dropout=0.1)

    # Eval mode (dropout disabled) -- matches torch module.eval().
    y = penc(x, deterministic=True)
    jax.block_until_ready(y)
    y_ref = x + penc.pe[:S][:, None, :]
    assert jnp.allclose(y, y_ref, atol=1e-5, rtol=1e-5)

    # Training mode: fused in-kernel dropout (stateless hash PRNG).
    y_drop = penc(x, deterministic=False, seed=123)
    jax.block_until_ready(y_drop)
    scale = 1.0 / (1.0 - penc.p)
    ok = jnp.all(jnp.isclose(y_drop, 0.0, atol=1e-7)
                 | jnp.isclose(y_drop, y_ref * scale, atol=1e-5, rtol=1e-5))
    assert bool(ok)

    print("KERNEL_OK")
</pallas_src>

<mosaic_0001>
module attributes {stable_mosaic.version = 11 : i64} {
  func.func @_pos_enc_kernel(%arg0: i32, %arg1: memref<1xi32, #tpu.memory_space<smem>>, %arg2: memref<8x64xf32, #tpu.memory_space<vmem>>, %arg3: memref<8x32xf32, #tpu.memory_space<vmem>>, %arg4: memref<8x64xf32, #tpu.memory_space<vmem>>) attributes {dimension_semantics = [#tpu.dimension_semantics<parallel>], iteration_bounds = array<i64: 1>, scalar_prefetch = 1 : i64, scratch_operands = 0 : i64, tpu.core_type = #tpu.core_type<tc>, window_params = [{transform_indices = @transform_0, window_bounds = array<i64: 8, 64>}, {transform_indices = @transform_1, window_bounds = array<i64: 8, 32>}, {transform_indices = @transform_2, window_bounds = array<i64: 8, 64>}]} {
    %c0 = arith.constant 0 : index
    %c0_0 = arith.constant 0 : index
    %0 = vector.load %arg2[%c0, %c0_0] : memref<8x64xf32, #tpu.memory_space<vmem>>, vector<8x64xf32>
    %c0_1 = arith.constant 0 : index
    %c0_2 = arith.constant 0 : index
    %1 = vector.load %arg3[%c0_1, %c0_2] : memref<8x32xf32, #tpu.memory_space<vmem>>, vector<8x32xf32>
    %2 = tpu.concatenate %1, %1 in 1 : vector<8x32xf32>, vector<8x32xf32> -> vector<8x64xf32>
    %3 = arith.addf %0, %2 : vector<8x64xf32>
    %c0_3 = arith.constant 0 : index
    %c0_4 = arith.constant 0 : index
    %4 = vector.load %arg4[%c0_3, %c0_4] : memref<8x64xf32, #tpu.memory_space<vmem>>, vector<8x64xf32>
    tpu.vector_store %arg4[%c0_3, %c0_4], %3 {strides = array<i32>} : memref<8x64xf32, #tpu.memory_space<vmem>>, vector<8x64xf32>,
    return
  }
  func.func @transform_0(%arg0: i32, %arg1: memref<1xi32, #tpu.memory_space<smem>>) -> (i32, i32) {
    %c0_i32 = arith.constant 0 : i32
    %c0_i32_0 = arith.constant 0 : i32
    return %arg0, %c0_i32 : i32, i32
  }
  func.func @transform_1(%arg0: i32, %arg1: memref<1xi32, #tpu.memory_space<smem>>) -> (i32, i32) {
    %c0_i32 = arith.constant 0 : i32
    %c0_i32_0 = arith.constant 0 : i32
    return %arg0, %c0_i32 : i32, i32
  }
  func.func @transform_2(%arg0: i32, %arg1: memref<1xi32, #tpu.memory_space<smem>>) -> (i32, i32) {
    %c0_i32 = arith.constant 0 : i32
    %c0_i32_0 = arith.constant 0 : i32
    return %arg0, %c0_i32 : i32, i32
  }
}

</mosaic_0001>

<bundles_post_ra>
// kernel: tpu_custom_call.1
= control target key start
LH: loop header
LB: loop body
LE: loop exit
PB: predicated region body
PF: predicated region fallthrough
CT: control target
= control target key end

     0   :  { %9 = vsyncpa [#allocation5], 0  ;;  %s143_s0 = inlined_call_operand.<no memory space> [shape: s32[1], index: 0, kind: input, shape index: {}]   ;;  %s144_s1 = inlined_call_operand.hbm [shape: f32[8,64], index: 1, kind: input, shape index: {}, may-alias: {1,3}]   ;;  %s145_s2 = inlined_call_operand.vmem [shape: f32[8,32], index: 2, kind: input, shape index: {}]   ;;  %s146_s3 = inlined_call_operand.hbm [shape: f32[8,64], index: 3, kind: output, shape index: {}, may-alias: {1,3}]  }
   0x1   :  { %10 = vsyncpa [#allocation6], 0  ;;  %s16_s14 = sshll.u32 %s144_s1, 4  ;;  %s111_s15 = smov [#allocation4]   ;;  %s17_s14 = int_to_ptr.hbm [resolvable:$true] %s16_s14 }
   0x2   :  { %s18_s16 = sshll.u32 %s111_s15, 4  ;;  %s19_s16 = int_to_ptr.vmem [resolvable:$true] %s18_s16 }
   0x3   :  { %21 = dma.hbm_to_vmem [thread:$0]  %s17_s14, 128, %s19_s16, [#allocation5]  }
   0x4   :  { %107 = dma.done.wait [#allocation5], 128  }
   0x5   :  { %108 = vsyncadd [#allocation5], 4294967168  ;;  %v29_v0 = vld [vmem:[%s145_s2] sm:$0xff]  ;;  %s112_s18 = smov 32   ;;  %vm34_vm0 = vcmask 261120   ;;  %s113_s19 = smov [#allocation7]  }
   0x6   :  { %31 = vrot.lane.b32.xlu0 %v29_v0, %s112_s18  ;;  %v28_v1 = vld [vmem:[#allocation4] sm:$0xff]  ;;  %s44_s20 = sshll.u32 %s113_s19, 4  ;;  %s46_s1 = sshll.u32 %s146_s3, 4  ;;  %vm37_vm1 = vcmask 523264   ;;  %s45_s20 = int_to_ptr.vmem [resolvable:$true] %s44_s20  ;;  %s47_s1 = int_to_ptr.hbm [resolvable:$true] %s46_s1 }
  0x78   :  { %v32_v2 = vpop.permute.xlu0 %31 }
  0x79   :  { %v35_v3 = vsel %vm34_vm0, %v29_v0, %v32_v2 }
  0x7a   :  { %v36_v4 = vadd.f32 %v35_v3, %v28_v1 }
  0x7c   :  { %38 = vst.msk [vmem:[#allocation7] sm:$0xff] %vm37_vm1, %v36_v4 }
  0x7d   :  { %49 = dma.vmem_to_hbm [thread:$0]  %s45_s20, 128, %s47_s1, [#allocation6]  }
  0x7e   :  { %109 = dma.done.wait [#allocation6], 128  }
  0x7f   :  { %110 = vsyncadd [#allocation6], 4294967168 }
  0x80   :  { %54 = vsyncpa [#allocation5], 1 }
  0x81   :  { %55 = vsyncpa [#allocation6], 1 }

</bundles_post_ra>
